<compile_context>
chip_gen: v6e
topology: v6e:2x2x1
jax: 0.10.0
libtpu: 0.0.40
codegen_flags: <defaults>
</compile_context>

<pallas_src>
from functools import lru_cache

import numpy as np
import jax
import jax.numpy as jnp
from jax import lax
from jax.experimental import pallas as pl
from jax.experimental.pallas import tpu as pltpu


# ----------------------------------------------------------------------------
# torchvision-compatible bilinear (antialiased triangle filter) resize weights
# ----------------------------------------------------------------------------
def _resize_weight_matrix(in_size: int, out_size: int) -> np.ndarray:
    """Dense (out_size, in_size) bilinear resize weights.

    Matches torchvision Resize default (bilinear, antialias=True): half-pixel
    centers, filter support scaled by max(in/out, 1) for downscaling, weights
    renormalized over in-range taps (handles borders).
    """
    scale = in_size / out_size
    support_scale = max(scale, 1.0)
    i = np.arange(out_size, dtype=np.float64)
    centers = (i + 0.5) * scale
    j = np.arange(in_size, dtype=np.float64)
    w = 1.0 - np.abs((j[None, :] + 0.5 - centers[:, None]) / support_scale)
    w = np.clip(w, 0.0, None)
    w = w / w.sum(axis=1, keepdims=True)
    return w.astype(np.float32)


# ----------------------------------------------------------------------------
# Pallas kernel: one BP-plane slab per grid step, two 2-D MXU matmuls per plane
# ----------------------------------------------------------------------------
def _resize_kernel(a_ref, bt_ref, x_ref, o_ref):
    # a_ref:  (H_out, H)        row-resize weights (resident, constant index map)
    # bt_ref: (W, W_out)        column-resize weights (resident)
    # x_ref:  (BP, H, W)        BP NCHW-contiguous planes (no host transpose)
    # o_ref:  (BP, H_out, W_out)
    bp = x_ref.shape[0]
    a = a_ref[...]
    bt = bt_ref[...]

    def body(p, carry):
        # H-pass: (H_out, H) @ (H, W) -> (H_out, W), f32 accumulate on the MXU
        t = jnp.dot(a, x_ref[p], preferred_element_type=jnp.float32)
        # keep both operands of the second dot in the compute dtype (bf16 path)
        t = t.astype(bt.dtype)
        # W-pass: (H_out, W) @ (W, W_out) -> (H_out, W_out)
        o = jnp.dot(t, bt, preferred_element_type=jnp.float32)
        o_ref[p] = o.astype(o_ref.dtype)
        return carry

    lax.fori_loop(0, bp, body, 0, unroll=(bp <= 8))


# ----------------------------------------------------------------------------
# Sizing heuristics
# ----------------------------------------------------------------------------
def _vmem_limit_bytes() -> int:
    """Generation-aware scoped VMEM limit (conservative fallback if unknown)."""
    try:
        kind = jax.devices()[0].device_kind.lower()
    except Exception:  # pragma: no cover
        kind = ""
    if "v7" in kind:
        return 48 * 1024 * 1024          # v7x: 64 MiB physical per TC
    if "v5" in kind or "v6" in kind:
        return 96 * 1024 * 1024          # v5e/v6e: 128 MiB physical
    return 32 * 1024 * 1024              # unknown: stay at a safe default


def _pad_up(a: int, m: int) -> int:
    return ((a + m - 1) // m) * m


def _choose_plane_batch(n_planes, H, W, H_out, W_out,
                        in_itemsize, out_itemsize, vmem_limit_bytes):
    """Largest plane batch BP (divisor of n_planes) fitting the VMEM budget.

    Prefers a grid G = n_planes/BP that is >= 2 and even so both v7x
    TensorCores get balanced work (free on single-TC v5e/v6e).  Block bytes
    are computed on (8, 128)-padded tiles, double-buffered, with the (tiny)
    weight matrices also double-buffered.
    """
    budget = int(vmem_limit_bytes * 0.75)   # headroom for Mosaic internal scratch

    def fits(bp):
        x_blk = bp * _pad_up(H, 8) * _pad_up(W, 128) * in_itemsize
        o_blk = bp * _pad_up(H_out, 8) * _pad_up(W_out, 128) * out_itemsize
        w_blk = (_pad_up(H_out, 8) * _pad_up(H, 128)
                 + _pad_up(W, 8) * _pad_up(W_out, 128)) * in_itemsize
        return 2 * (x_blk + o_blk) + 2 * w_blk <= budget

    divisors = [d for d in range(1, n_planes + 1) if n_planes % d == 0]
    prefs = (
        lambda g: g >= 2 and g % 2 == 0,   # best: even grid >= 2 (v7x balance)
        lambda g: g >= 2,                  # ok:   grid >= 2
        lambda g: True,                    # fallback (e.g. n_planes == 1)
    )
    for pref in prefs:
        cands = [d for d in divisors if pref(n_planes // d) and fits(d)]
        if cands:
            return max(cands)
    return 1


# ----------------------------------------------------------------------------
# Compiled pallas_call, cached per (shape, chosen scale, dtype, plane batch)
# ----------------------------------------------------------------------------
@lru_cache(maxsize=None)
def _build_resize_call(P, H, W, H_out, W_out, bp, in_dtype, out_dtype,
                       vmem_limit_bytes):
    G = P // bp
    in_itemsize = np.dtype(in_dtype).itemsize
    out_itemsize = np.dtype(out_dtype).itemsize

    flops = 2 * P * H_out * W * (H + W_out)
    bytes_accessed = int(P * H * W * in_itemsize
                         + (H_out * H + W * W_out) * in_itemsize
                         + P * H_out * W_out * out_itemsize)

    call = pl.pallas_call(
        _resize_kernel,
        out_shape=jax.ShapeDtypeStruct((P, H_out, W_out), out_dtype),
        grid=(G,),
        in_specs=[
            # Constant index maps -> weights fetched once, stay resident.
            pl.BlockSpec((H_out, H), lambda i: (0, 0)),       # A
            pl.BlockSpec((W, W_out), lambda i: (0, 0)),       # B^T
            pl.BlockSpec((bp, H, W), lambda i: (i, 0, 0)),    # plane slab
        ],
        out_specs=pl.BlockSpec((bp, H_out, W_out), lambda i: (i, 0, 0)),
        compiler_params=pltpu.CompilerParams(
            dimension_semantics=("parallel",),
            vmem_limit_bytes=vmem_limit_bytes,
        ),
        cost_estimate=pl.CostEstimate(
            flops=flops, transcendentals=0, bytes_accessed=bytes_accessed),
    )
    return jax.jit(call)


# ----------------------------------------------------------------------------
# Wrapper (forward-pass semantics of RandomScaleTransform)
# ----------------------------------------------------------------------------
def random_scale_transform(x, scales, rng, *, use_bf16=False):
    """Pallas implementation of RandomScaleTransform.forward.

    x: (N, C, H, W) float array.  `rng` is an int seed or np.random.Generator
    (host-side choice, since the chosen scale fixes the static output shape).
    Returns (N, C, int(H*s), int(W*s)) for a uniformly chosen scale s.
    """
    assert x.ndim == 4
    N, C, H, W = x.shape

    if not isinstance(rng, np.random.Generator):
        rng = np.random.default_rng(rng)
    idx = int(rng.integers(0, len(scales)))            # host-side, no device sync
    scale = scales[idx]
    H_out, W_out = int(H * scale), int(W * scale)

    in_dtype = jnp.bfloat16 if use_bf16 else jnp.float32
    out_dtype = in_dtype                                # halves output DMA in bf16
    in_itemsize = np.dtype(in_dtype).itemsize
    out_itemsize = np.dtype(out_dtype).itemsize

    P = N * C
    vmem_limit = _vmem_limit_bytes()
    bp = _choose_plane_batch(P, H, W, H_out, W_out,
                             in_itemsize, out_itemsize, vmem_limit)

    A = jnp.asarray(_resize_weight_matrix(H, H_out), dtype=in_dtype)   # (H_out, H)
    Bt = jnp.asarray(_resize_weight_matrix(W, W_out).T, dtype=in_dtype)  # (W, W_out)

    # Free reshape only -- no HBM transpose / repack.
    x_p = x.reshape(P, H, W).astype(in_dtype)

    call = _build_resize_call(P, H, W, H_out, W_out, bp,
                              jnp.dtype(in_dtype).name if False else in_dtype,
                              out_dtype, vmem_limit)
    out = call(A, Bt, x_p)                              # (P, H_out, W_out)

    out = out.reshape(N, C, H_out, W_out)               # free reshape back to NCHW
    return out.astype(x.dtype)


if __name__ == "__main__":
    key = jax.random.PRNGKey(0)

    N, C, H, W = 2, 4, 16, 16
    x = jax.random.normal(key, (N, C, H, W), dtype=jnp.float32)
    scales = [0.5, 0.75, 1.25]
    seed = 0

    out = random_scale_transform(x, scales, seed)
    out = jax.block_until_ready(out)

    # Reference check (pure JAX): out[n,c] = A @ x[n,c] @ B^T with the same
    # host-side scale pick.
    idx = int(np.random.default_rng(seed).integers(0, len(scales)))
    s = scales[idx]
    H_out, W_out = int(H * s), int(W * s)
    A = jnp.asarray(_resize_weight_matrix(H, H_out))
    B = jnp.asarray(_resize_weight_matrix(W, W_out))
    ref = jnp.einsum("oh,nchw,pw->ncop", A, x, B)

    assert out.shape == (N, C, H_out, W_out), out.shape
    assert jnp.allclose(out, ref, atol=1e-5, rtol=1e-5), \
        float(jnp.max(jnp.abs(out - ref)))

    print("KERNEL_OK")
</pallas_src>

<mosaic_0001>
module attributes {stable_mosaic.version = 11 : i64} {
  func.func @_resize_kernel(%arg0: i32, %arg1: memref<20x16xf32, #tpu.memory_space<vmem>>, %arg2: memref<16x20xf32, #tpu.memory_space<vmem>>, %arg3: memref<4x16x16xf32, #tpu.memory_space<vmem>>, %arg4: memref<4x20x20xf32, #tpu.memory_space<vmem>>) attributes {dimension_semantics = [#tpu.dimension_semantics<parallel>], iteration_bounds = array<i64: 2>, scalar_prefetch = 0 : i64, scratch_operands = 0 : i64, tpu.core_type = #tpu.core_type<tc>, window_params = [{pipeline_mode = #tpu.pipeline_mode<synchronous>, transform_indices = @transform_0, window_bounds = array<i64: 20, 16>}, {pipeline_mode = #tpu.pipeline_mode<synchronous>, transform_indices = @transform_1, window_bounds = array<i64: 16, 20>}, {transform_indices = @transform_2, window_bounds = array<i64: 4, 16, 16>}, {transform_indices = @transform_3, window_bounds = array<i64: 4, 20, 20>}]} {
    %c0 = arith.constant 0 : index
    %c0_0 = arith.constant 0 : index
    %0 = vector.load %arg1[%c0, %c0_0] : memref<20x16xf32, #tpu.memory_space<vmem>>, vector<20x16xf32>
    %c0_1 = arith.constant 0 : index
    %c0_2 = arith.constant 0 : index
    %1 = vector.load %arg2[%c0_1, %c0_2] : memref<16x20xf32, #tpu.memory_space<vmem>>, vector<16x20xf32>
    %c0_i32 = arith.constant 0 : i32
    %2 = arith.index_cast %c0_i32 : i32 to index
    %c0_3 = arith.constant 0 : index
    %c0_4 = arith.constant 0 : index
    %3 = vector.load %arg3[%2, %c0_3, %c0_4] : memref<4x16x16xf32, #tpu.memory_space<vmem>>, vector<1x16x16xf32>
    %4 = vector.shape_cast %3 : vector<1x16x16xf32> to vector<16x16xf32>
    %cst = arith.constant dense<0.000000e+00> : vector<20x16xf32>
    %5 = tpu.matmul %0, %4, %cst {dimension_numbers = #tpu.dot_dimension_numbers<[1], [0], [0], [1], [0, 0, 1, 1], [], []>} : vector<20x16xf32>, vector<16x16xf32>, vector<20x16xf32> -> vector<20x16xf32>
    %cst_5 = arith.constant dense<0.000000e+00> : vector<20x20xf32>
    %6 = tpu.matmul %5, %1, %cst_5 {dimension_numbers = #tpu.dot_dimension_numbers<[1], [0], [0], [1], [0, 0, 1, 1], [], []>} : vector<20x16xf32>, vector<16x20xf32>, vector<20x20xf32> -> vector<20x20xf32>
    %7 = arith.index_cast %c0_i32 : i32 to index
    %c0_6 = arith.constant 0 : index
    %c0_7 = arith.constant 0 : index
    %8 = vector.load %arg4[%7, %c0_6, %c0_7] : memref<4x20x20xf32, #tpu.memory_space<vmem>>, vector<1x20x20xf32>
    %9 = vector.shape_cast %8 : vector<1x20x20xf32> to vector<20x20xf32>
    %10 = vector.shape_cast %6 : vector<20x20xf32> to vector<1x20x20xf32>
    tpu.vector_store %arg4[%7, %c0_6, %c0_7], %10 {strides = array<i32>} : memref<4x20x20xf32, #tpu.memory_space<vmem>>, vector<1x20x20xf32>,
    %c1_i32 = arith.constant 1 : i32
    %11 = arith.index_cast %c1_i32 : i32 to index
    %c0_8 = arith.constant 0 : index
    %c0_9 = arith.constant 0 : index
    %12 = vector.load %arg3[%11, %c0_8, %c0_9] : memref<4x16x16xf32, #tpu.memory_space<vmem>>, vector<1x16x16xf32>
    %13 = vector.shape_cast %12 : vector<1x16x16xf32> to vector<16x16xf32>
    %cst_10 = arith.constant dense<0.000000e+00> : vector<20x16xf32>
    %14 = tpu.matmul %0, %13, %cst_10 {dimension_numbers = #tpu.dot_dimension_numbers<[1], [0], [0], [1], [0, 0, 1, 1], [], []>} : vector<20x16xf32>, vector<16x16xf32>, vector<20x16xf32> -> vector<20x16xf32>
    %cst_11 = arith.constant dense<0.000000e+00> : vector<20x20xf32>
    %15 = tpu.matmul %14, %1, %cst_11 {dimension_numbers = #tpu.dot_dimension_numbers<[1], [0], [0], [1], [0, 0, 1, 1], [], []>} : vector<20x16xf32>, vector<16x20xf32>, vector<20x20xf32> -> vector<20x20xf32>
    %16 = arith.index_cast %c1_i32 : i32 to index
    %c0_12 = arith.constant 0 : index
    %c0_13 = arith.constant 0 : index
    %17 = vector.load %arg4[%16, %c0_12, %c0_13] : memref<4x20x20xf32, #tpu.memory_space<vmem>>, vector<1x20x20xf32>
    %18 = vector.shape_cast %17 : vector<1x20x20xf32> to vector<20x20xf32>
    %19 = vector.shape_cast %15 : vector<20x20xf32> to vector<1x20x20xf32>
    tpu.vector_store %arg4[%16, %c0_12, %c0_13], %19 {strides = array<i32>} : memref<4x20x20xf32, #tpu.memory_space<vmem>>, vector<1x20x20xf32>,
    %c2_i32 = arith.constant 2 : i32
    %20 = arith.index_cast %c2_i32 : i32 to index
    %c0_14 = arith.constant 0 : index
    %c0_15 = arith.constant 0 : index
    %21 = vector.load %arg3[%20, %c0_14, %c0_15] : memref<4x16x16xf32, #tpu.memory_space<vmem>>, vector<1x16x16xf32>
    %22 = vector.shape_cast %21 : vector<1x16x16xf32> to vector<16x16xf32>
    %cst_16 = arith.constant dense<0.000000e+00> : vector<20x16xf32>
    %23 = tpu.matmul %0, %22, %cst_16 {dimension_numbers = #tpu.dot_dimension_numbers<[1], [0], [0], [1], [0, 0, 1, 1], [], []>} : vector<20x16xf32>, vector<16x16xf32>, vector<20x16xf32> -> vector<20x16xf32>
    %cst_17 = arith.constant dense<0.000000e+00> : vector<20x20xf32>
    %24 = tpu.matmul %23, %1, %cst_17 {dimension_numbers = #tpu.dot_dimension_numbers<[1], [0], [0], [1], [0, 0, 1, 1], [], []>} : vector<20x16xf32>, vector<16x20xf32>, vector<20x20xf32> -> vector<20x20xf32>
    %25 = arith.index_cast %c2_i32 : i32 to index
    %c0_18 = arith.constant 0 : index
    %c0_19 = arith.constant 0 : index
    %26 = vector.load %arg4[%25, %c0_18, %c0_19] : memref<4x20x20xf32, #tpu.memory_space<vmem>>, vector<1x20x20xf32>
    %27 = vector.shape_cast %26 : vector<1x20x20xf32> to vector<20x20xf32>
    %28 = vector.shape_cast %24 : vector<20x20xf32> to vector<1x20x20xf32>
    tpu.vector_store %arg4[%25, %c0_18, %c0_19], %28 {strides = array<i32>} : memref<4x20x20xf32, #tpu.memory_space<vmem>>, vector<1x20x20xf32>,
    %c3_i32 = arith.constant 3 : i32
    %29 = arith.index_cast %c3_i32 : i32 to index
    %c0_20 = arith.constant 0 : index
    %c0_21 = arith.constant 0 : index
    %30 = vector.load %arg3[%29, %c0_20, %c0_21] : memref<4x16x16xf32, #tpu.memory_space<vmem>>, vector<1x16x16xf32>
    %31 = vector.shape_cast %30 : vector<1x16x16xf32> to vector<16x16xf32>
    %cst_22 = arith.constant dense<0.000000e+00> : vector<20x16xf32>
    %32 = tpu.matmul %0, %31, %cst_22 {dimension_numbers = #tpu.dot_dimension_numbers<[1], [0], [0], [1], [0, 0, 1, 1], [], []>} : vector<20x16xf32>, vector<16x16xf32>, vector<20x16xf32> -> vector<20x16xf32>
    %cst_23 = arith.constant dense<0.000000e+00> : vector<20x20xf32>
    %33 = tpu.matmul %32, %1, %cst_23 {dimension_numbers = #tpu.dot_dimension_numbers<[1], [0], [0], [1], [0, 0, 1, 1], [], []>} : vector<20x16xf32>, vector<16x20xf32>, vector<20x20xf32> -> vector<20x20xf32>
    %34 = arith.index_cast %c3_i32 : i32 to index
    %c0_24 = arith.constant 0 : index
    %c0_25 = arith.constant 0 : index
    %35 = vector.load %arg4[%34, %c0_24, %c0_25] : memref<4x20x20xf32, #tpu.memory_space<vmem>>, vector<1x20x20xf32>
    %36 = vector.shape_cast %35 : vector<1x20x20xf32> to vector<20x20xf32>
    %37 = vector.shape_cast %33 : vector<20x20xf32> to vector<1x20x20xf32>
    tpu.vector_store %arg4[%34, %c0_24, %c0_25], %37 {strides = array<i32>} : memref<4x20x20xf32, #tpu.memory_space<vmem>>, vector<1x20x20xf32>,
    %c4_i32 = arith.constant 4 : i32
    return
  }
  func.func @transform_0(%arg0: i32) -> (i32, i32) {
    %c0_i32 = arith.constant 0 : i32
    %c0_i32_0 = arith.constant 0 : i32
    %c0_i32_1 = arith.constant 0 : i32
    return %c0_i32, %c0_i32_0 : i32, i32
  }
  func.func @transform_1(%arg0: i32) -> (i32, i32) {
    %c0_i32 = arith.constant 0 : i32
    %c0_i32_0 = arith.constant 0 : i32
    %c0_i32_1 = arith.constant 0 : i32
    return %c0_i32, %c0_i32_0 : i32, i32
  }
  func.func @transform_2(%arg0: i32) -> (i32, i32, i32) {
    %c0_i32 = arith.constant 0 : i32
    %c0_i32_0 = arith.constant 0 : i32
    %c0_i32_1 = arith.constant 0 : i32
    return %arg0, %c0_i32, %c0_i32_0 : i32, i32, i32
  }
  func.func @transform_3(%arg0: i32) -> (i32, i32, i32) {
    %c0_i32 = arith.constant 0 : i32
    %c0_i32_0 = arith.constant 0 : i32
    %c0_i32_1 = arith.constant 0 : i32
    return %arg0, %c0_i32, %c0_i32_0 : i32, i32, i32
  }
}

</mosaic_0001>

<bundles_post_ra>
// kernel: tpu_custom_call.1
= control target key start
LH: loop header
LB: loop body
LE: loop exit
PB: predicated region body
PF: predicated region fallthrough
CT: control target
= control target key end

     0   :  { %8 = vsyncpa [#allocation3], 0  ;;  %s1561_s0 = inlined_call_operand.vmem [shape: f32[20,16], index: 0, kind: input, shape index: {}]   ;;  %s1562_s1 = inlined_call_operand.vmem [shape: f32[16,20], index: 1, kind: input, shape index: {}]   ;;  %s1563_s2 = inlined_call_operand.hbm [shape: f32[8,16,16], index: 2, kind: input, shape index: {}]   ;;  %s1564_s3 = inlined_call_operand.vmem [shape: f32[8,20,20], index: 3, kind: output, shape index: {}]  }
   0x1   :  { %10 = vsyncpa [#allocation3 + $0x1], 0  ;;  %s1316_s12 = smov 0   ;;  %s1318_s13 = smov 0  }
   0x2   :  { %s1320_s14 = smov 0   ;;  %s1322_s15 = smov 0  }
   0x3 LB: > { %s984_s16 = sadd.s32 4294967295, %s1289_s15   ;;  %s1336_s17 = sadd.s32 1, %s1289_s15   ;;  %s1289_s15 = sphi %s1322_s15, %s1573_s15   ;;  %s1285_s14 = sphi %s1320_s14, %s1572_s14   ;;  %s1281_s13 = sphi %s1318_s13, %s1571_s13   ;;  %s1277_s12 = sphi %s1316_s12, %s1570_s12  }
   0x4   : > { %s62_s18 = ssub.s32 %s1289_s15, %s1336_s17  ;;  %s65_s19 = sadd.s32 1, %s1285_s14 }
   0x5   : > { %p63_p0 = scmp.eq.s32.totalorder %s62_s18, 0  ;;  %p72_p1 = scmp.ne.s32.totalorder %s1285_s14, %s1281_s13 }
   0x6   : > { %p73_p2 = scmp.eq.s32.totalorder %s1289_s15, 0  ;;  %p78_p3 = scmp.ne.s32.totalorder %s1281_s13, %s1277_s12 }
   0x7   : > { %s1346_s20 = scalar_select %p63_p0, %s1285_s14, %s65_s19  }
   0x8   : > { %p74_p4 = por %p73_p2, %p72_p1  ;;  %p79_p5 = scmp.eq.s32.totalorder %s984_s16, 0 }
   0x9   : > { %p1190_p6 = scmp.lt.s32.totalorder %s1289_s15, 2  ;;  %s134_s22 = sand.u32 1, %s1285_s14  }
   0xa   : > { %p1351_p7 = por %p79_p5, %p78_p3  ;;  %s988_s23 = sshll.u32 %s134_s22, 6 }
   0xb   : > { %s1038_s24 = sshll.u32 %s1289_s15, 10  ;;  %s138_s28 = scalar_lea.vmem [#allocation2], %s988_s23 }
   0xc   : > { %s1566_s21 = scalar_select %p1351_p7, 1, 0 }
   0xd   : > { %s1360_s27 = scalar_lea.hbm %s1563_s2, %s1038_s24  ;;  %s146_s29 = sshll.u32 %s138_s28, 4  ;;  %s1362_s29 = int_to_ptr.vmem [resolvable:$true] %s146_s29 }
   0xe   : > { %p1364_p8 = pnand %p1190_p6, %p74_p4  ;;  %s1369_s4 = scalar_lea.sflag [#allocation3], %s134_s22 }
   0xf   : > { %s1227_s5 = scalar_lea.hbm %s1360_s27, 1024  ;;  %s1232_s8 = scalar_lea.hbm %s1563_s2, 2048 }
  0x10   : > { %p1228_p10 = scmp.ne.s32.totalorder %s1360_s27, %s1227_s5  ;;  %p1229_p11 = pneg %p1364_p8 }
  0x11   : > { %p1233_p0 = scmp.lt.s32.totalorder %s1360_s27, %s1563_s2  ;;  %p1234_p1 = scmp.lt.s32.totalorder %s1232_s8, %s1227_s5 }
  0x12   : > { %p1230_p12 = pnand %p1229_p11, %p1228_p10 }
  0x13   : > { %p1235_p2 = por %p1234_p1, %p1233_p0 }
  0x14   : > { %p1231_p13 = pneg %p1230_p12 }
  0x16   : > { %p1236_p3 = pnand %p1235_p2, %p1231_p13 }
  0x18   : > { %1239 = shalt.err (!%p1236_p3)
}
  0x19   : > { %s1240_s11 = scalar_lea.vmem %s1362_s29, 1024  ;;  %s1291_s12 = smov [#allocation2]  }
  0x1a   : > { %p1241_p4 = scmp.ne.s32.totalorder %s1362_s29, %s1240_s11  ;;  %s1245_s18 = sshll.u32 %s1291_s12, 4  ;;  %s1246_s18 = int_to_ptr.vmem [resolvable:$false] %s1245_s18 }
  0x1b   : > { %s1247_s19 = scalar_lea.vmem %s1246_s18, 2048  ;;  %p1248_p10 = scmp.lt.s32.totalorder %s1362_s29, %s1246_s18 }
  0x1c   : > { %p1243_p5 = pnand %p1241_p4, %p1229_p11  ;;  %p1249_p12 = scmp.lt.s32.totalorder %s1247_s19, %s1240_s11 }
  0x1e   : > { %p1244_p6 = pneg %p1243_p5  ;;  %p1250_p9 = por %p1249_p12, %p1248_p10 }
  0x20   : > { %p1251_p7 = pnand %p1250_p9, %p1244_p6 }
  0x22   : > { %1254 = shalt.err (!%p1251_p7)
}
  0x23   : > { %s1292_s22 = smov 128   ;;  %s1293_s23 = smov 8  }
  0x24   : > { %1189 = dma.hbm_to_vmem [thread:$0]  (!%p1364_p8), %s1360_s27, 1024, %s1362_s29, %s1369_s4, %s1292_s22, %s1292_s22, %s1293_s23  }
  0x25   : > { %p154_p11 = scmp.lt.s32.totalorder %s1289_s15, 3  ;;  %p1568_p13 = scmp.ge.s32.totalorder %s1289_s15, 1 }
  0x27   : > { %p155_p0 = pnand %p1568_p13, %p154_p11 }
  0x28   : > { %s160_s24 = sand.u32 (!%p155_p0), 1, %s1281_s13   ;;  %p1569_p7 = scmp.ne.s32.totalorder (!%p155_p0), %s1566_s21, 0 }
  0x29   : > { %158 = sbr.rel (%p155_p0) target bundleno = 485 (0x1e5), region = 32  ;;  %s993_s25 = sshll.u32 (!%p155_p0), %s160_s24, 6 }
  0x2a   : > { %s161_s26 = scalar_lea.sflag (!%p155_p0), [#allocation3], %s160_s24  ;;  %s1394_s28 = scalar_lea.vmem (!%p155_p0), [#allocation2], %s993_s25 }
  0x2e   : > { %1272 = dma.done.wait (%p1569_p7), %s161_s26, 1024  }
  0x2f   : > { %1274 = vsyncadd (%p1569_p7), %s161_s26, 4294966272  ;;  %v1294_v0 = vmov 0.0   ;;  %vm1295_vm0 = vmmov 0   ;;  %v202_v1 = vld [vmem:[%s1394_s28 + $0x8] sm:$0xff]  ;;  %v201_v2 = vld [vmem:[%s1394_s28] sm:$0xff]  ;;  %vm203_vm1 = vcmask 130048  }
  0x30   : > { %1079 = vmatprep.subr.mxu0 %v1294_v0  ;;  %1083 = vmatprep.mubr.msk.f32.mxu0 %vm1295_vm0, %v1294_v0  ;;  %v196_v3 = vld [vmem:[%s1561_s0] sm:$0xff]  ;;  %v1003_v4 = vld [vmem:[%s1394_s28 + $0x18] sm:$0xff]  ;;  %v1416_v5 = vld [vmem:[%s1562_s1 + $0x8] sm:$0xff]  ;;  %s994_s10 = sshll.u32 %s984_s16, 2  ;;  %vm382_vm2 = vcmask 162816   ;;  %vm385_vm3 = vcmask 158720  }
  0x31   : > { %1092 = vmatprep.subr.mxu1 %v1294_v0  ;;  %1096 = vmatprep.mubr.msk.f32.mxu1 %vm1295_vm0, %v1294_v0  ;;  %v1002_v6 = vld [vmem:[%s1394_s28 + $0x10] sm:$0xff]  ;;  %v197_v7 = vld [vmem:[%s1561_s0 + $0x8] sm:$0xff]  ;;  %v1013_v10 = vld [vmem:[%s1394_s28 + $0x20] sm:$0xff]  ;;  %p190_p8 = scmp.lt.s32.totalorder %s994_s10, 7 }
  0x32   : > { %1080 = vmatpush3.msra.mxu0 %v202_v1  ;;  %1093 = vmatpush3.msra.mxu1 %v1416_v5  ;;  %v198_v8 = vld [vmem:[%s1561_s0 + $0x10] sm:$0xf]  ;;  %v1014_v9 = vld [vmem:[%s1394_s28 + $0x28] sm:$0xff]  ;;  %v1025_v11 = vld [vmem:[%s1394_s28 + $0x38] sm:$0xff] }
  0x33   : > { %1081 = vmatprep.subr.mxu0 %v1294_v0  ;;  %1094 = vmatprep.subr.mxu1 %v1294_v0  ;;  %v1024_v12 = vld [vmem:[%s1394_s28 + $0x30] sm:$0xff]  ;;  %v199_v13 = vld [vmem:[%s1562_s1] sm:$0xff]  ;;  %s1575_s10 = smov (!%p190_p8, %s994_s10), 7 }
  0x34   : > { %1082 = vmatpush3.msra.mxu0 %v201_v2  ;;  %1095 = vmatpush3.msra.mxu1 %v199_v13  ;;  %s1183_s11 = smul.u32 24, %s1575_s10 }
  0x35   : > { %1084 = vmatmul.mubr.msk.f32.vlgmr.msra.gmra.mxu0 %vm203_vm1, %v196_v3  ;;  %1105 = vmatprep.subr.mxu0 %v1294_v0 }
  0x36   : > { %1106 = vmatpush3.msra.mxu0 %v1003_v4  ;;  %1086 = vmatprep.mubr.msk.f32.mxu0 %vm1295_vm0, %v1294_v0  ;;  %s1522_s19 = scalar_lea.vmem %s1564_s3, %s1183_s11 }
  0x37   : > { %1107 = vmatprep.subr.mxu0 %v1294_v0  ;;  %1118 = vmatprep.subr.mxu1 %v1294_v0 }
  0x38   : > { %1108 = vmatpush3.msra.mxu0 %v1002_v6 }
  0x39   : > { %1087 = vmatmul.mubr.msk.f32.gmra.mxu0 %vm203_vm1, %v197_v7  ;;  %1131 = vmatprep.subr.mxu0 %v1294_v0 }
  0x3a   : > { %1089 = vmatprep.mubr.msk.f32.mxu0 %vm1295_vm0, %v1294_v0 }
  0x3d   : > { %1090 = vmatmul.mubr.msk.f32.gmra.mxu0 %vm203_vm1, %v198_v8 }
  0x3e   : > { %1109 = vmatprep.mubr.msk.f32.mxu0 %vm1295_vm0, %v1294_v0 }
  0x41   : > { %1110 = vmatmul.mubr.msk.f32.vlgmr.msra.gmra.mxu0 %vm203_vm1, %v196_v3 }
  0x42   : > { %1132 = vmatpush3.msra.mxu0 %v1014_v9  ;;  %1112 = vmatprep.mubr.msk.f32.mxu0 %vm1295_vm0, %v1294_v0 }
  0x43   : > { %1133 = vmatprep.subr.mxu0 %v1294_v0 }
  0x44   : > { %1134 = vmatpush3.msra.mxu0 %v1013_v10 }
  0x45   : > { %1113 = vmatmul.mubr.msk.f32.gmra.mxu0 %vm203_vm1, %v197_v7  ;;  %1157 = vmatprep.subr.mxu0 %v1294_v0 }
  0x46   : > { %1115 = vmatprep.mubr.msk.f32.mxu0 %vm1295_vm0, %v1294_v0 }
  0x49   : > { %1116 = vmatmul.mubr.msk.f32.gmra.mxu0 %vm203_vm1, %v198_v8 }
  0x4a   : > { %1135 = vmatprep.mubr.msk.f32.mxu0 %vm1295_vm0, %v1294_v0 }
  0x4d   : > { %1136 = vmatmul.mubr.msk.f32.vlgmr.msra.gmra.mxu0 %vm203_vm1, %v196_v3 }
  0x4e   : > { %1158 = vmatpush3.msra.mxu0 %v1025_v11  ;;  %1138 = vmatprep.mubr.msk.f32.mxu0 %vm1295_vm0, %v1294_v0 }
  0x4f   : > { %1159 = vmatprep.subr.mxu0 %v1294_v0 }
  0x50   : > { %1160 = vmatpush3.msra.mxu0 %v1024_v12 }
  0x51   : > { %1139 = vmatmul.mubr.msk.f32.gmra.mxu0 %vm203_vm1, %v197_v7 }
  0x52   : > { %1141 = vmatprep.mubr.msk.f32.mxu0 %vm1295_vm0, %v1294_v0 }
  0x55   : > { %1142 = vmatmul.mubr.msk.f32.gmra.mxu0 %vm203_vm1, %v198_v8 }
  0x56   : > { %1161 = vmatprep.mubr.msk.f32.mxu0 %vm1295_vm0, %v1294_v0 }
  0x59   : > { %1162 = vmatmul.mubr.msk.f32.vlgmr.msra.gmra.mxu0 %vm203_vm1, %v196_v3 }
  0x5a   : > { %1164 = vmatprep.mubr.msk.f32.mxu0 %vm1295_vm0, %v1294_v0 }
  0x5d   : > { %1165 = vmatmul.mubr.msk.f32.gmra.mxu0 %vm203_vm1, %v197_v7 }
  0x5e   : > { %1167 = vmatprep.mubr.msk.f32.mxu0 %vm1295_vm0, %v1294_v0 }
  0x61   : > { %1168 = vmatmul.mubr.msk.f32.gmra.mxu0 %vm203_vm1, %v198_v8 }
  0xf5   : > { %v279_v14 = vpop.f32.mrf.mxu0 }
  0xf6   : > { %1097 = vmatmul.mubr.msk.f32.vlgmr.msra.gmra.mxu1 %vm203_vm1, %v279_v14 }
  0xf7   : > { %v1085_v15 = vpop.f32.mrf.mxu0  ;;  %1119 = vmatpush3.msra.mxu1 %v1416_v5  ;;  %1099 = vmatprep.mubr.msk.f32.mxu1 %vm1295_vm0, %v1294_v0 }
  0xf8   : > { %1120 = vmatprep.subr.mxu1 %v1294_v0 }
  0xf9   : > { %v284_v16 = vpop.f32.mrf.mxu0  ;;  %1121 = vmatpush3.msra.mxu1 %v199_v13 }
  0xfa   : > { %1100 = vmatmul.mubr.msk.f32.gmra.mxu1 %vm203_vm1, %v284_v16  ;;  %1144 = vmatprep.subr.mxu1 %v1294_v0 }
  0xfb   : > { %v1088_v17 = vpop.f32.mrf.mxu0  ;;  %1102 = vmatprep.mubr.msk.f32.mxu1 %vm1295_vm0, %v1294_v0 }
  0xfd   : > { %v289_v18 = vpop.f32.mrf.mxu0 }
  0xfe   : > { %1103 = vmatmul.mubr.msk.f32.gmra.mxu1 %vm203_vm1, %v289_v18 }
  0xff   : > { %v1091_v19 = vpop.f32.mrf.mxu0  ;;  %1122 = vmatprep.mubr.msk.f32.mxu1 %vm1295_vm0, %v1294_v0 }
 0x101   : > { %v456_v20 = vpop.f32.mrf.mxu0 }
 0x102   : > { %1123 = vmatmul.mubr.msk.f32.vlgmr.msra.gmra.mxu1 %vm203_vm1, %v456_v20 }
 0x103   : > { %v1111_v21 = vpop.f32.mrf.mxu0  ;;  %1145 = vmatpush3.msra.mxu1 %v1416_v5  ;;  %1125 = vmatprep.mubr.msk.f32.mxu1 %vm1295_vm0, %v1294_v0 }
 0x104   : > { %1146 = vmatprep.subr.mxu1 %v1294_v0 }
 0x105   : > { %v461_v22 = vpop.f32.mrf.mxu0  ;;  %1147 = vmatpush3.msra.mxu1 %v199_v13 }
 0x106   : > { %1126 = vmatmul.mubr.msk.f32.gmra.mxu1 %vm203_vm1, %v461_v22  ;;  %1170 = vmatprep.subr.mxu1 %v1294_v0 }
 0x107   : > { %v1114_v23 = vpop.f32.mrf.mxu0  ;;  %1128 = vmatprep.mubr.msk.f32.mxu1 %vm1295_vm0, %v1294_v0 }
 0x109   : > { %v466_v24 = vpop.f32.mrf.mxu0 }
 0x10a   : > { %1129 = vmatmul.mubr.msk.f32.gmra.mxu1 %vm203_vm1, %v466_v24 }
 0x10b   : > { %v1117_v25 = vpop.f32.mrf.mxu0  ;;  %1148 = vmatprep.mubr.msk.f32.mxu1 %vm1295_vm0, %v1294_v0 }
 0x10d   : > { %v632_v26 = vpop.f32.mrf.mxu0 }
 0x10e   : > { %1149 = vmatmul.mubr.msk.f32.vlgmr.msra.gmra.mxu1 %vm203_vm1, %v632_v26 }
 0x10f   : > { %v1137_v27 = vpop.f32.mrf.mxu0  ;;  %1171 = vmatpush3.msra.mxu1 %v1416_v5  ;;  %1151 = vmatprep.mubr.msk.f32.mxu1 %vm1295_vm0, %v1294_v0 }
 0x110   : > { %1172 = vmatprep.subr.mxu1 %v1294_v0 }
 0x111   : > { %v637_v28 = vpop.f32.mrf.mxu0  ;;  %1173 = vmatpush3.msra.mxu1 %v199_v13 }
 0x112   : > { %1152 = vmatmul.mubr.msk.f32.gmra.mxu1 %vm203_vm1, %v637_v28 }
 0x113   : > { %v1140_v29 = vpop.f32.mrf.mxu0  ;;  %1154 = vmatprep.mubr.msk.f32.mxu1 %vm1295_vm0, %v1294_v0 }
 0x115   : > { %v642_v30 = vpop.f32.mrf.mxu0 }
 0x116   : > { %1155 = vmatmul.mubr.msk.f32.gmra.mxu1 %vm203_vm1, %v642_v30 }
 0x117   : > { %v1143_v31 = vpop.f32.mrf.mxu0  ;;  %1174 = vmatprep.mubr.msk.f32.mxu1 %vm1295_vm0, %v1294_v0 }
 0x119   : > { %v808_v32 = vpop.f32.mrf.mxu0 }
 0x11a   : > { %1175 = vmatmul.mubr.msk.f32.vlgmr.msra.gmra.mxu1 %vm203_vm1, %v808_v32 }
 0x11b   : > { %v1163_v33 = vpop.f32.mrf.mxu0  ;;  %1177 = vmatprep.mubr.msk.f32.mxu1 %vm1295_vm0, %v1294_v0 }
 0x11d   : > { %v813_v34 = vpop.f32.mrf.mxu0 }
 0x11e   : > { %1178 = vmatmul.mubr.msk.f32.gmra.mxu1 %vm203_vm1, %v813_v34 }
 0x11f   : > { %v1166_v35 = vpop.f32.mrf.mxu0  ;;  %1180 = vmatprep.mubr.msk.f32.mxu1 %vm1295_vm0, %v1294_v0 }
 0x121   : > { %v818_v36 = vpop.f32.mrf.mxu0 }
 0x122   : > { %1181 = vmatmul.mubr.msk.f32.gmra.mxu1 %vm203_vm1, %v818_v36 }
 0x123   : > { %v1169_v37 = vpop.f32.mrf.mxu0 }
 0x1b6   : > { %v368_v38 = vpop.f32.mrf.mxu1 }
 0x1b7   : > { %383 = vst.msk [vmem:[%s1522_s19] sm:$0xff] %vm382_vm2, %v368_v38 }
 0x1b8   : > { %v1098_v39 = vpop.f32.mrf.mxu1 }
 0x1ba   : > { %v373_v40 = vpop.f32.mrf.mxu1 }
 0x1bb   : > { %384 = vst.msk [vmem:[%s1522_s19 + $0x8] sm:$0xff] %vm382_vm2, %v373_v40 }
 0x1bc   : > { %v1101_v41 = vpop.f32.mrf.mxu1 }
 0x1be   : > { %v378_v42 = vpop.f32.mrf.mxu1 }
 0x1bf   : > { %386 = vst.msk [vmem:[%s1522_s19 + $0x10] sm:$0xf] %vm385_vm3, %v378_v42 }
 0x1c0   : > { %v1104_v43 = vpop.f32.mrf.mxu1 }
 0x1c2   : > { %v545_v44 = vpop.f32.mrf.mxu1 }
 0x1c3   : > { %1010 = vst.msk [vmem:[%s1522_s19 + $0x18] sm:$0xff] %vm382_vm2, %v545_v44 }
 0x1c4   : > { %v1124_v45 = vpop.f32.mrf.mxu1 }
 0x1c6   : > { %v550_v46 = vpop.f32.mrf.mxu1 }
 0x1c7   : > { %1011 = vst.msk [vmem:[%s1522_s19 + $0x20] sm:$0xff] %vm382_vm2, %v550_v46 }
 0x1c8   : > { %v1127_v47 = vpop.f32.mrf.mxu1 }
 0x1ca   : > { %v555_v48 = vpop.f32.mrf.mxu1 }
 0x1cb   : > { %1012 = vst.msk [vmem:[%s1522_s19 + $0x28] sm:$0xf] %vm385_vm3, %v555_v48 }
 0x1cc   : > { %v1130_v49 = vpop.f32.mrf.mxu1 }
 0x1ce   : > { %v721_v50 = vpop.f32.mrf.mxu1 }
 0x1cf   : > { %1021 = vst.msk [vmem:[%s1522_s19 + $0x30] sm:$0xff] %vm382_vm2, %v721_v50 }
 0x1d0   : > { %v1150_v51 = vpop.f32.mrf.mxu1 }
 0x1d2   : > { %v726_v52 = vpop.f32.mrf.mxu1 }
 0x1d3   : > { %1022 = vst.msk [vmem:[%s1522_s19 + $0x38] sm:$0xff] %vm382_vm2, %v726_v52 }
 0x1d4   : > { %v1153_v53 = vpop.f32.mrf.mxu1 }
 0x1d6   : > { %v731_v54 = vpop.f32.mrf.mxu1 }
 0x1d7   : > { %1023 = vst.msk [vmem:[%s1522_s19 + $0x40] sm:$0xf] %vm385_vm3, %v731_v54 }
 0x1d8   : > { %v1156_v55 = vpop.f32.mrf.mxu1 }
 0x1da   : > { %v897_v56 = vpop.f32.mrf.mxu1 }
 0x1db   : > { %1032 = vst.msk [vmem:[%s1522_s19 + $0x48] sm:$0xff] %vm382_vm2, %v897_v56 }
 0x1dc   : > { %v1176_v57 = vpop.f32.mrf.mxu1 }
 0x1de   : > { %v902_v58 = vpop.f32.mrf.mxu1 }
 0x1df   : > { %1033 = vst.msk [vmem:[%s1522_s19 + $0x50] sm:$0xff] %vm382_vm2, %v902_v58 }
 0x1e0   : > { %v1179_v59 = vpop.f32.mrf.mxu1 }
 0x1e2   : > { %v907_v60 = vpop.f32.mrf.mxu1 }
 0x1e3   : > { %1034 = vst.msk [vmem:[%s1522_s19 + $0x58] sm:$0xf] %vm385_vm3, %v907_v60 }
 0x1e4   : > { %v1182_v61 = vpop.f32.mrf.mxu1 }
 0x1e5 PF: > { %p13_p9 = scmp.ge.s32.totalorder %s1336_s17, 4   ;;  %s1570_s12 = smov %s1281_s13 }
 0x1e6   : > { %s1571_s13 = smov %s1285_s14  ;;  %s1572_s14 = smov %s1346_s20 }
 0x1e7   : > { %s1573_s15 = smov %s1336_s17  ;;  %15 = sbr.rel (!%p13_p9) target bundleno = 3 (0x3), region = 78 }
 0x1ec   :  { %939 = vsyncpa [#allocation3], 1 }
 0x1ed   :  { %941 = vsyncpa [#allocation3 + $0x1], 1 }

</bundles_post_ra>
